<compile_context>
chip_gen: v7x
topology: tpu7x:2x2x1
jax: 0.10.0
libtpu: 0.0.40
codegen_flags: <defaults>
</compile_context>

<pallas_src>
import jax
import jax.numpy as jnp
from jax.experimental import pallas as pl
from jax.experimental.pallas import tpu as pltpu


def _affine_kernel(u_ref, a_ref, lo_ref, x_ref):
    # Pure VPU elementwise affine: x = u * A + lo (single full-width store).
    x_ref[...] = u_ref[...] * a_ref[...] + lo_ref[...]


def _round_up(n, m):
    return ((n + m - 1) // m) * m


def _vmem_limit_bytes():
    # Generation-aware VMEM limit: 3/4 of physical per-TensorCore capacity
    # (v7x: 64 MiB -> 48 MiB, v5e/v6e: 128 MiB -> 96 MiB).
    try:
        cap = int(pltpu.get_tpu_info().vmem_capacity_bytes)
    except Exception:  # conservative fallback (v7x-sized)
        cap = 64 * 1024 * 1024
    return cap * 3 // 4


def _row_tile(rows, cols, tile_budget_bytes):
    """Sublane-dense batch tile sized by bytes; keep >=2 grid steps along the
    batch axis when possible so v7x's two TensorCores both get work."""
    if rows < 8:
        return rows                       # block equals full array dim (legal)
    bytes_per_row = cols * 4
    tb = max(8, (tile_budget_bytes // bytes_per_row) // 8 * 8)
    tb = min(tb, (rows // 8) * 8)
    if tb >= rows and rows > 8:           # would collapse to one grid step
        tb = max(8, _round_up(pl.cdiv(rows, 2), 8))
    return tb


def _launch(u2, a_row, lo_row, tb, td, vmem_limit, donate_u):
    rows, cols = u2.shape
    grid = (pl.cdiv(rows, tb), pl.cdiv(cols, td))
    cost = pl.CostEstimate(flops=2 * rows * cols,
                           transcendentals=0,
                           bytes_accessed=8 * rows * cols)
    return pl.pallas_call(
        _affine_kernel,
        out_shape=jax.ShapeDtypeStruct((rows, cols), u2.dtype),
        grid=grid,
        in_specs=[
            pl.BlockSpec((tb, td), lambda i, j: (i, j)),   # u tile (pipelined)
            pl.BlockSpec((1, td), lambda i, j: (0, j)),    # A   (VMEM resident)
            pl.BlockSpec((1, td), lambda i, j: (0, j)),    # lo  (VMEM resident)
        ],
        out_specs=pl.BlockSpec((tb, td), lambda i, j: (i, j)),
        compiler_params=pltpu.CompilerParams(
            dimension_semantics=("parallel", "parallel"),
            vmem_limit_bytes=vmem_limit,
        ),
        cost_estimate=cost,
        input_output_aliases=({0: 0} if donate_u else {}),
    )(u2, a_row, lo_row)


def linear_map_forward(u, bounds, donate_u=False):
    """Pallas equivalent of Linear.forward.

    Args:
      u:      (batch, dim) float32
      bounds: (dim, 2)     float32, columns (lo, hi).  Precondition: hi > lo
              (otherwise log_jac is NaN/-inf, matching the PyTorch reference).
      donate_u: alias u's HBM buffer for x (only beneficial if the caller
              donates u; otherwise XLA would insert a copy, so default False).

    Returns:
      x:       (batch, dim) = u * (hi - lo) + lo
      log_jac: (batch,)     = log(prod(hi - lo)) per row
    """
    batch, dim = u.shape
    dt = u.dtype
    lo = bounds[:, 0].astype(dt)
    a = (bounds[:, 1] - bounds[:, 0]).astype(dt)

    # Log-jacobian is constant w.r.t. u -> computed once, outside the kernel.
    log_jac = jnp.full((batch,), jnp.sum(jnp.log(a)), dtype=dt)

    vmem_limit = _vmem_limit_bytes()
    # u + x tiles, each double-buffered => 4 live tiles; keep them well under
    # the limit (headroom for resident A/lo rows + compiler scratch).
    tile_budget = min(8 * 1024 * 1024, vmem_limit // 8)

    if dim <= 128 and 128 % dim == 0 and (batch * dim) % 128 == 0:
        # Lane-packed fast path for tiny dims: reshape the contiguous
        # row-major (batch, dim) buffer to (rows, 128) (free layout-wise) and
        # broadcast A/lo by tiling across the 128-lane row.  No padded HBM
        # bytes, full-width unmasked stores.
        reps = 128 // dim
        rows = (batch * dim) // 128
        u2 = u.reshape(rows, 128)
        a_row = jnp.tile(a, reps).reshape(1, 128)
        lo_row = jnp.tile(lo, reps).reshape(1, 128)
        tb = _row_tile(rows, 128, tile_budget)
        x2 = _launch(u2, a_row, lo_row, tb, 128, vmem_limit, donate_u)
        x = x2.reshape(batch, dim)
    else:
        # General path: exact out_shape, no padding of u, no slicing of x;
        # ragged trailing blocks are masked by Pallas (garbage rows discarded).
        a_row = a.reshape(1, dim)
        lo_row = lo.reshape(1, dim)
        if dim % 128 == 0:
            max_td = max(128, (tile_budget // (8 * 4)) // 128 * 128)
            td = min(dim, max_td)          # tile the lane axis for wide rows
        else:
            # Block covers the full (non-128-multiple) dim.
            # TODO(synk): extremely wide non-128-multiple dims (>~1M cols)
            # would need a lane-axis split + tail handling to stay in VMEM.
            td = dim
        tb = _row_tile(batch, td, tile_budget)
        x = _launch(u, a_row, lo_row, tb, td, vmem_limit, donate_u)

    return x, log_jac


if __name__ == "__main__":
    # Deterministic parameters: bounds for a 4-dimensional box.
    dim = 4
    bounds = jnp.array(
        [[-1.0, 1.0],
         [0.0, 2.0],
         [2.0, 5.0],
         [-3.0, 3.0]],
        dtype=jnp.float32,
    )
    A = bounds[:, 1] - bounds[:, 0]
    lo = bounds[:, 0]

    key = jax.random.PRNGKey(0)
    k1, k2 = jax.random.split(key)

    # 1) Lane-packed path (batch * dim divisible by 128).
    batch = 32
    u = jax.random.uniform(k1, (batch, dim), dtype=jnp.float32)
    x, log_jac = linear_map_forward(u, bounds)
    jax.block_until_ready((x, log_jac))
    x_ref = u * A + lo
    lj_ref = jnp.full((batch,), jnp.log(jnp.prod(A)), dtype=jnp.float32)
    assert jnp.allclose(x, x_ref, atol=1e-6), "x mismatch (lane-packed path)"
    assert jnp.allclose(log_jac, lj_ref, atol=1e-5), "log_jac mismatch"

    # 2) General ragged-block path (batch * dim NOT divisible by 128).
    batch2 = 10
    u2 = jax.random.uniform(k2, (batch2, dim), dtype=jnp.float32)
    x2, lj2 = linear_map_forward(u2, bounds)
    jax.block_until_ready((x2, lj2))
    assert jnp.allclose(x2, u2 * A + lo, atol=1e-6), "x mismatch (general path)"
    assert jnp.allclose(lj2, jnp.full((batch2,), jnp.log(jnp.prod(A))), atol=1e-5)

    print("KERNEL_OK")
</pallas_src>

<mosaic_0001>
module attributes {stable_mosaic.version = 11 : i64} {
  func.func @_affine_kernel(%arg0: i32, %arg1: i32, %arg2: memref<1x128xf32, #tpu.memory_space<vmem>>, %arg3: memref<1x128xf32, #tpu.memory_space<vmem>>, %arg4: memref<1x128xf32, #tpu.memory_space<vmem>>, %arg5: memref<1x128xf32, #tpu.memory_space<vmem>>) attributes {dimension_semantics = [#tpu.dimension_semantics<parallel>, #tpu.dimension_semantics<parallel>], iteration_bounds = array<i64: 1, 1>, scalar_prefetch = 0 : i64, scratch_operands = 0 : i64, tpu.core_type = #tpu.core_type<tc>, window_params = [{transform_indices = @transform_0, window_bounds = array<i64: 1, 128>}, {transform_indices = @transform_1, window_bounds = array<i64: 1, 128>}, {transform_indices = @transform_2, window_bounds = array<i64: 1, 128>}, {transform_indices = @transform_3, window_bounds = array<i64: 1, 128>}]} {
    %c0 = arith.constant 0 : index
    %c0_0 = arith.constant 0 : index
    %0 = vector.load %arg2[%c0, %c0_0] : memref<1x128xf32, #tpu.memory_space<vmem>>, vector<1x128xf32>
    %c0_1 = arith.constant 0 : index
    %c0_2 = arith.constant 0 : index
    %1 = vector.load %arg3[%c0_1, %c0_2] : memref<1x128xf32, #tpu.memory_space<vmem>>, vector<1x128xf32>
    %2 = arith.mulf %0, %1 : vector<1x128xf32>
    %c0_3 = arith.constant 0 : index
    %c0_4 = arith.constant 0 : index
    %3 = vector.load %arg4[%c0_3, %c0_4] : memref<1x128xf32, #tpu.memory_space<vmem>>, vector<1x128xf32>
    %4 = arith.addf %2, %3 : vector<1x128xf32>
    %c0_5 = arith.constant 0 : index
    %c0_6 = arith.constant 0 : index
    %5 = vector.load %arg5[%c0_5, %c0_6] : memref<1x128xf32, #tpu.memory_space<vmem>>, vector<1x128xf32>
    tpu.vector_store %arg5[%c0_5, %c0_6], %4 {strides = array<i32>} : memref<1x128xf32, #tpu.memory_space<vmem>>, vector<1x128xf32>,
    return
  }
  func.func @transform_0(%arg0: i32, %arg1: i32) -> (i32, i32) {
    %c0_i32 = arith.constant 0 : i32
    return %arg0, %arg1 : i32, i32
  }
  func.func @transform_1(%arg0: i32, %arg1: i32) -> (i32, i32) {
    %c0_i32 = arith.constant 0 : i32
    %c0_i32_0 = arith.constant 0 : i32
    return %c0_i32, %arg1 : i32, i32
  }
  func.func @transform_2(%arg0: i32, %arg1: i32) -> (i32, i32) {
    %c0_i32 = arith.constant 0 : i32
    %c0_i32_0 = arith.constant 0 : i32
    return %c0_i32, %arg1 : i32, i32
  }
  func.func @transform_3(%arg0: i32, %arg1: i32) -> (i32, i32) {
    %c0_i32 = arith.constant 0 : i32
    return %arg0, %arg1 : i32, i32
  }
}

</mosaic_0001>

<bundles_post_ra>
// kernel: tpu_custom_call.1
= control target key start
LH: loop header
LB: loop body
LE: loop exit
PB: predicated region body
PF: predicated region fallthrough
CT: control target
= control target key end

     0   :  { %8 = vsyncpa [#allocation3], 0  ;;  %s150_s0 = inlined_call_operand.hbm [shape: f32[1,128], index: 0, kind: input, shape index: {}]   ;;  %s151_s1 = inlined_call_operand.vmem [shape: f32[1,128], index: 1, kind: input, shape index: {}]   ;;  %s152_s2 = inlined_call_operand.vmem [shape: f32[1,128], index: 2, kind: input, shape index: {}]   ;;  %s153_s3 = inlined_call_operand.hbm [shape: f32[1,128], index: 3, kind: output, shape index: {}]  }
   0x1   :  { %9 = vsyncpa [#allocation4], 0  ;;  %s98_s12 = smov [#allocation2]   ;;  %s50_s16 = scalar_lea.hbm %s150_s0, 16 }
   0x2   :  { %s16_s13 = sshll.u32 %s98_s12, 4  ;;  %p51_p0 = scmp.ne.s32.totalorder %s150_s0, %s50_s16  ;;  %s17_s13 = int_to_ptr.vmem [resolvable:$true] %s16_s13 }
   0x3   :  { %p54_p1 = scmp.lt.u32.totalorder %s50_s16, %s150_s0 }
   0x5   :  { %p56_p2 = pnand %p54_p1, %p51_p0 }
   0x7   :  { %59 = shalt.err (!%p56_p2)
}
   0x8   :  { %s60_s21 = scalar_lea.vmem %s17_s13, 16  ;;  %s64_s22 = scalar_lea.vmem %s17_s13, 32 }
   0x9   :  { %p61_p3 = scmp.ne.s32.totalorder %s17_s13, %s60_s21  ;;  %p65_p4 = scmp.lt.s32.totalorder %s17_s13, %s17_s13 }
   0xa   :  { %p66_p5 = scmp.lt.s32.totalorder %s64_s22, %s60_s21 }
   0xc   :  { %p67_p6 = por %p66_p5, %p65_p4 }
   0xe   :  { %p68_p7 = pnand %p67_p6, %p61_p3 }
  0x10   :  { %71 = shalt.err (!%p68_p7)
}
  0x11   :  { %19 = dma.hbm_to_vmem [thread:$0]  %s150_s0, 16, %s17_s13, [#allocation3]  }
  0x12   :  { %94 = dma.done.wait [#allocation3], 16  }
  0x13   :  { %95 = vsyncadd [#allocation3], 4294967280  ;;  %s99_s25 = smov [#allocation5]   ;;  %v27_v0 = vld [vmem:[#allocation2] sm:$0x1] }
  0x14   :  { %s39_s26 = sshll.u32 %s99_s25, 4  ;;  %v28_v1 = vld [vmem:[%s151_s1] sm:$0x1]  ;;  %s40_s26 = int_to_ptr.vmem [resolvable:$true] %s39_s26 }
  0x15   :  { %v30_v2 = vld [vmem:[%s152_s2] sm:$0x1]  ;;  %v29_v3 = vmul.f32 %v28_v1, %v27_v0  ;;  %s72_s4 = scalar_lea.vmem %s40_s26, 16  ;;  %s76_s0 = scalar_lea.vmem %s40_s26, 32 }
  0x16   :  { %p73_p8 = scmp.ne.s32.totalorder %s40_s26, %s72_s4  ;;  %p77_p9 = scmp.lt.s32.totalorder %s40_s26, %s40_s26 }
  0x17   :  { %v31_v4 = vadd.f32 %v30_v2, %v29_v3  ;;  %p78_p10 = scmp.lt.s32.totalorder %s76_s0, %s72_s4 }
  0x19   :  { %32 = vst [vmem:[#allocation5] sm:$0x1] %v31_v4  ;;  %p79_p11 = por %p78_p10, %p77_p9 }
  0x1b   :  { %p80_p12 = pnand %p79_p11, %p73_p8 }
  0x1d   :  { %83 = shalt.err (!%p80_p12)
}
  0x1e   :  { %s84_s1 = scalar_lea.hbm %s153_s3, 16 }
  0x1f   :  { %p85_p13 = scmp.ne.s32.totalorder %s153_s3, %s84_s1  ;;  %p88_p0 = scmp.lt.u32.totalorder %s84_s1, %s153_s3 }
  0x21   :  { %p90_p1 = pnand %p88_p0, %p85_p13 }
  0x23   :  { %93 = shalt.err (!%p90_p1)
}
  0x24   :  { %42 = dma.vmem_to_hbm [thread:$0]  %s40_s26, 16, %s153_s3, [#allocation4]  }
  0x25   :  { %96 = dma.done.wait [#allocation4], 16  }
  0x26   :  { %97 = vsyncadd [#allocation4], 4294967280 }
  0x27   :  { %46 = vsyncpa [#allocation3], 1 }
  0x28   :  { %47 = vsyncpa [#allocation4], 1 }

</bundles_post_ra>
